<compile_context>
chip_gen: v7x
topology: tpu7x:2x2x1
jax: 0.10.0
libtpu: 0.0.40
codegen_flags: <defaults>
</compile_context>

<pallas_src>
import functools

import jax
import jax.numpy as jnp
from jax.experimental import pallas as pl
from jax.experimental.pallas import tpu as pltpu

INPUT_DIM = 300
HID1 = 200
HID2 = 150
HID3 = 200
OUT_DIM = 300

# lane-dense padded hidden dims (multiples of 128); input/output stay unpadded
H1_P = 256
H2_P = 256
H3_P = 256


def _cdiv(a, b):
    return -(-a // b)


def _round_up(n, m):
    return ((n + m - 1) // m) * m


def autoencoder_kernel(x_ref,
                       w1_ref, b1_ref,
                       w2_ref, b2_ref,
                       w3_ref, b3_ref,
                       w4_ref, b4_ref,
                       o_ref):
    # cast to bf16 only at the MXU input; accumulate + elementwise in f32
    x = x_ref[...].astype(jnp.bfloat16)                      # (bt, 300)

    # encoder: Linear(300,200) -> ReLU -> Linear(200,150)    (hidden dims padded to 256)
    h1 = jnp.dot(x, w1_ref[...], preferred_element_type=jnp.float32) + b1_ref[...]
    h1 = jnp.maximum(h1, 0.0).astype(jnp.bfloat16)
    enc = jnp.dot(h1, w2_ref[...], preferred_element_type=jnp.float32) + b2_ref[...]
    enc = enc.astype(jnp.bfloat16)

    # decoder: Linear(150,200) -> ReLU -> Linear(200,300)
    h3 = jnp.dot(enc, w3_ref[...], preferred_element_type=jnp.float32) + b3_ref[...]
    h3 = jnp.maximum(h3, 0.0).astype(jnp.bfloat16)
    out = jnp.dot(h3, w4_ref[...], preferred_element_type=jnp.float32) + b4_ref[...]

    o_ref[...] = out.astype(o_ref.dtype)


def prepare_params(params):
    """One-time prep (hoisted out of the per-call path): transpose PyTorch
    (out,in) weights to (in,out), zero-pad hidden dims to 256, cast weights to
    bf16. Input K (300) and output N (300) are left unpadded so activations
    need no wrapper-side pad/slice. Biases stay f32 (added to f32 accumulator)."""
    def pad_w(w_t, rows, cols):
        return jnp.pad(w_t, ((0, rows - w_t.shape[0]),
                             (0, cols - w_t.shape[1]))).astype(jnp.bfloat16)

    def pad_b(b, cols):
        return jnp.pad(b, (0, cols - b.shape[0])).reshape(1, -1).astype(jnp.float32)

    w1 = pad_w(params["w1"].T, INPUT_DIM, H1_P)   # (300, 256)
    w2 = pad_w(params["w2"].T, H1_P, H2_P)        # (256, 256)
    w3 = pad_w(params["w3"].T, H2_P, H3_P)        # (256, 256)
    w4 = pad_w(params["w4"].T, H3_P, OUT_DIM)     # (256, 300)
    b1 = pad_b(params["b1"], H1_P)
    b2 = pad_b(params["b2"], H2_P)
    b3 = pad_b(params["b3"], H3_P)
    b4 = pad_b(params["b4"], OUT_DIM)
    return (w1, b1, w2, b2, w3, b3, w4, b4)


def _choose_batch_tile(B, batch_tile):
    """Balanced batch tiles; >=2 grid steps when there's enough work so the
    parallel batch axis shards across both TensorCores on v7x."""
    n_tiles = _cdiv(B, batch_tile)
    if n_tiles < 2 and B >= 512:
        n_tiles = 2
    bt = _round_up(_cdiv(B, n_tiles), 16)   # 16: bf16 sublane packing
    bt = min(bt, B)                         # bt == B (full dim) is always legal
    return bt


@functools.partial(jax.jit, static_argnames=("batch_tile", "out_dtype"))
def autoencoder_forward(x, prepared, *, batch_tile=1024, out_dtype=None):
    """x: (B, 300) float32. `prepared` = prepare_params(params)."""
    B = x.shape[0]
    if out_dtype is None:
        out_dtype = x.dtype
    w1, b1, w2, b2, w3, b3, w4, b4 = prepared

    bt = _choose_batch_tile(B, batch_tile)
    grid = (_cdiv(B, bt),)

    # whole-array VMEM residency for the (grid-invariant) weights/biases:
    # no per-step pipelining, no double buffering.
    vmem_full = pl.BlockSpec(memory_space=pltpu.MemorySpace.VMEM)

    flops = 2 * B * (INPUT_DIM * H1_P + H1_P * H2_P + H2_P * H3_P + H3_P * OUT_DIM)
    bytes_accessed = (
        B * INPUT_DIM * x.dtype.itemsize
        + B * OUT_DIM * jnp.dtype(out_dtype).itemsize
        + sum(int(a.size) * a.dtype.itemsize for a in prepared)
    )

    return pl.pallas_call(
        autoencoder_kernel,
        out_shape=jax.ShapeDtypeStruct((B, OUT_DIM), out_dtype),
        grid_spec=pltpu.PrefetchScalarGridSpec(
            num_scalar_prefetch=0,
            grid=grid,
            in_specs=[
                pl.BlockSpec((bt, INPUT_DIM), lambda i: (i, 0)),  # x (pipelined)
                vmem_full, vmem_full,                              # w1, b1
                vmem_full, vmem_full,                              # w2, b2
                vmem_full, vmem_full,                              # w3, b3
                vmem_full, vmem_full,                              # w4, b4
            ],
            out_specs=pl.BlockSpec((bt, OUT_DIM), lambda i: (i, 0)),
        ),
        compiler_params=pltpu.CompilerParams(
            dimension_semantics=("parallel",),
            # raise v5e's 16 MiB scoped default so bt up to ~2048 fits everywhere
            vmem_limit_bytes=32 * 1024 * 1024,
        ),
        cost_estimate=pl.CostEstimate(
            flops=int(flops), transcendentals=0,
            bytes_accessed=int(bytes_accessed)),
    )(x, w1, b1, w2, b2, w3, b3, w4, b4)


def init_params(key):
    """Deterministic synthetic init mirroring nn.Linear default
    (uniform(-1/sqrt(fan_in), 1/sqrt(fan_in)) for weight and bias)."""
    dims = [(HID1, INPUT_DIM), (HID2, HID1), (HID3, HID2), (OUT_DIM, HID3)]
    params = {}
    for idx, (out_d, in_d) in enumerate(dims, start=1):
        key, kw, kb = jax.random.split(key, 3)
        bound = 1.0 / jnp.sqrt(in_d)
        params[f"w{idx}"] = jax.random.uniform(
            kw, (out_d, in_d), jnp.float32, -bound, bound)
        params[f"b{idx}"] = jax.random.uniform(
            kb, (out_d,), jnp.float32, -bound, bound)
    return params


def reference_forward(x, params):
    h = jnp.maximum(x @ params["w1"].T + params["b1"], 0.0)
    enc = h @ params["w2"].T + params["b2"]
    h = jnp.maximum(enc @ params["w3"].T + params["b3"], 0.0)
    return h @ params["w4"].T + params["b4"]


if __name__ == "__main__":
    key = jax.random.PRNGKey(0)
    params = init_params(key)
    prepared = prepare_params(params)

    # two batch sizes: a small odd one (single partial-ish tile) and one that
    # exercises the 2-step grid with a partial last block
    for B in (50, 600):
        key, kx = jax.random.split(key)
        x = jax.random.normal(kx, (B, INPUT_DIM), jnp.float32)

        out = autoencoder_forward(x, prepared)
        out = jax.block_until_ready(out)

        ref = reference_forward(x, params)
        assert out.shape == (B, OUT_DIM)
        # bf16 MXU inputs with f32 accumulation -> loosened tolerance vs f32 reference
        assert jnp.allclose(out, ref, atol=2e-2, rtol=2e-2), f"mismatch vs reference (B={B})"

    print("KERNEL_OK")
</pallas_src>

<mosaic_0001>
module attributes {stable_mosaic.version = 11 : i64} {
  func.func @autoencoder_kernel(%arg0: i32, %arg1: memref<50x300xf32, #tpu.memory_space<vmem>>, %arg2: memref<300x256xbf16, #tpu.memory_space<vmem>>, %arg3: memref<1x256xf32, #tpu.memory_space<vmem>>, %arg4: memref<256x256xbf16, #tpu.memory_space<vmem>>, %arg5: memref<1x256xf32, #tpu.memory_space<vmem>>, %arg6: memref<256x256xbf16, #tpu.memory_space<vmem>>, %arg7: memref<1x256xf32, #tpu.memory_space<vmem>>, %arg8: memref<256x300xbf16, #tpu.memory_space<vmem>>, %arg9: memref<1x300xf32, #tpu.memory_space<vmem>>, %arg10: memref<50x300xf32, #tpu.memory_space<vmem>>) attributes {dimension_semantics = [#tpu.dimension_semantics<parallel>], iteration_bounds = array<i64: 1>, scalar_prefetch = 0 : i64, scratch_operands = 0 : i64, tpu.core_type = #tpu.core_type<tc>, window_params = [{transform_indices = @transform_0, window_bounds = array<i64: 50, 300>}, {pipeline_mode = #tpu.pipeline_mode<synchronous>, transform_indices = @transform_1, window_bounds = array<i64: 300, 256>}, {pipeline_mode = #tpu.pipeline_mode<synchronous>, transform_indices = @transform_2, window_bounds = array<i64: 1, 256>}, {pipeline_mode = #tpu.pipeline_mode<synchronous>, transform_indices = @transform_3, window_bounds = array<i64: 256, 256>}, {pipeline_mode = #tpu.pipeline_mode<synchronous>, transform_indices = @transform_4, window_bounds = array<i64: 1, 256>}, {pipeline_mode = #tpu.pipeline_mode<synchronous>, transform_indices = @transform_5, window_bounds = array<i64: 256, 256>}, {pipeline_mode = #tpu.pipeline_mode<synchronous>, transform_indices = @transform_6, window_bounds = array<i64: 1, 256>}, {pipeline_mode = #tpu.pipeline_mode<synchronous>, transform_indices = @transform_7, window_bounds = array<i64: 256, 300>}, {pipeline_mode = #tpu.pipeline_mode<synchronous>, transform_indices = @transform_8, window_bounds = array<i64: 1, 300>}, {transform_indices = @transform_9, window_bounds = array<i64: 50, 300>}]} {
    %c0 = arith.constant 0 : index
    %c0_0 = arith.constant 0 : index
    %0 = vector.load %arg1[%c0, %c0_0] : memref<50x300xf32, #tpu.memory_space<vmem>>, vector<50x300xf32>
    %1 = arith.truncf %0 : vector<50x300xf32> to vector<50x300xbf16>
    %c0_1 = arith.constant 0 : index
    %c0_2 = arith.constant 0 : index
    %2 = vector.load %arg2[%c0_1, %c0_2] : memref<300x256xbf16, #tpu.memory_space<vmem>>, vector<300x256xbf16>
    %cst = arith.constant dense<0.000000e+00> : vector<50x256xf32>
    %3 = tpu.matmul %1, %2, %cst {dimension_numbers = #tpu.dot_dimension_numbers<[1], [0], [0], [1], [0, 0, 1, 1], [], []>} : vector<50x300xbf16>, vector<300x256xbf16>, vector<50x256xf32> -> vector<50x256xf32>
    %c0_3 = arith.constant 0 : index
    %c0_4 = arith.constant 0 : index
    %4 = vector.load %arg3[%c0_3, %c0_4] : memref<1x256xf32, #tpu.memory_space<vmem>>, vector<1x256xf32>
    %5 = vector.broadcast %4 : vector<1x256xf32> to vector<50x256xf32>
    %6 = arith.addf %3, %5 : vector<50x256xf32>
    %cst_5 = arith.constant 0.000000e+00 : f32
    %7 = vector.broadcast %cst_5 : f32 to vector<50x256xf32>
    %8 = arith.maximumf %6, %7 : vector<50x256xf32>
    %9 = arith.truncf %8 : vector<50x256xf32> to vector<50x256xbf16>
    %c0_6 = arith.constant 0 : index
    %c0_7 = arith.constant 0 : index
    %10 = vector.load %arg4[%c0_6, %c0_7] : memref<256x256xbf16, #tpu.memory_space<vmem>>, vector<256x256xbf16>
    %cst_8 = arith.constant dense<0.000000e+00> : vector<50x256xf32>
    %11 = tpu.matmul %9, %10, %cst_8 {dimension_numbers = #tpu.dot_dimension_numbers<[1], [0], [0], [1], [0, 0, 1, 1], [], []>} : vector<50x256xbf16>, vector<256x256xbf16>, vector<50x256xf32> -> vector<50x256xf32>
    %c0_9 = arith.constant 0 : index
    %c0_10 = arith.constant 0 : index
    %12 = vector.load %arg5[%c0_9, %c0_10] : memref<1x256xf32, #tpu.memory_space<vmem>>, vector<1x256xf32>
    %13 = vector.broadcast %12 : vector<1x256xf32> to vector<50x256xf32>
    %14 = arith.addf %11, %13 : vector<50x256xf32>
    %15 = arith.truncf %14 : vector<50x256xf32> to vector<50x256xbf16>
    %c0_11 = arith.constant 0 : index
    %c0_12 = arith.constant 0 : index
    %16 = vector.load %arg6[%c0_11, %c0_12] : memref<256x256xbf16, #tpu.memory_space<vmem>>, vector<256x256xbf16>
    %cst_13 = arith.constant dense<0.000000e+00> : vector<50x256xf32>
    %17 = tpu.matmul %15, %16, %cst_13 {dimension_numbers = #tpu.dot_dimension_numbers<[1], [0], [0], [1], [0, 0, 1, 1], [], []>} : vector<50x256xbf16>, vector<256x256xbf16>, vector<50x256xf32> -> vector<50x256xf32>
    %c0_14 = arith.constant 0 : index
    %c0_15 = arith.constant 0 : index
    %18 = vector.load %arg7[%c0_14, %c0_15] : memref<1x256xf32, #tpu.memory_space<vmem>>, vector<1x256xf32>
    %19 = vector.broadcast %18 : vector<1x256xf32> to vector<50x256xf32>
    %20 = arith.addf %17, %19 : vector<50x256xf32>
    %cst_16 = arith.constant 0.000000e+00 : f32
    %21 = vector.broadcast %cst_16 : f32 to vector<50x256xf32>
    %22 = arith.maximumf %20, %21 : vector<50x256xf32>
    %23 = arith.truncf %22 : vector<50x256xf32> to vector<50x256xbf16>
    %c0_17 = arith.constant 0 : index
    %c0_18 = arith.constant 0 : index
    %24 = vector.load %arg8[%c0_17, %c0_18] : memref<256x300xbf16, #tpu.memory_space<vmem>>, vector<256x300xbf16>
    %cst_19 = arith.constant dense<0.000000e+00> : vector<50x300xf32>
    %25 = tpu.matmul %23, %24, %cst_19 {dimension_numbers = #tpu.dot_dimension_numbers<[1], [0], [0], [1], [0, 0, 1, 1], [], []>} : vector<50x256xbf16>, vector<256x300xbf16>, vector<50x300xf32> -> vector<50x300xf32>
    %c0_20 = arith.constant 0 : index
    %c0_21 = arith.constant 0 : index
    %26 = vector.load %arg9[%c0_20, %c0_21] : memref<1x300xf32, #tpu.memory_space<vmem>>, vector<1x300xf32>
    %27 = vector.broadcast %26 : vector<1x300xf32> to vector<50x300xf32>
    %28 = arith.addf %25, %27 : vector<50x300xf32>
    %c0_22 = arith.constant 0 : index
    %c0_23 = arith.constant 0 : index
    %29 = vector.load %arg10[%c0_22, %c0_23] : memref<50x300xf32, #tpu.memory_space<vmem>>, vector<50x300xf32>
    tpu.vector_store %arg10[%c0_22, %c0_23], %28 {strides = array<i32>} : memref<50x300xf32, #tpu.memory_space<vmem>>, vector<50x300xf32>,
    return
  }
  func.func @transform_0(%arg0: i32) -> (i32, i32) {
    %c0_i32 = arith.constant 0 : i32
    %c0_i32_0 = arith.constant 0 : i32
    return %arg0, %c0_i32 : i32, i32
  }
  func.func @transform_1(%arg0: i32) -> (i32, i32) {
    %c0_i32 = arith.constant 0 : i32
    %c0_i32_0 = arith.constant 0 : i32
    %c0_i32_1 = arith.constant 0 : i32
    return %c0_i32, %c0_i32_0 : i32, i32
  }
  func.func @transform_2(%arg0: i32) -> (i32, i32) {
    %c0_i32 = arith.constant 0 : i32
    %c0_i32_0 = arith.constant 0 : i32
    %c0_i32_1 = arith.constant 0 : i32
    return %c0_i32, %c0_i32_0 : i32, i32
  }
  func.func @transform_3(%arg0: i32) -> (i32, i32) {
    %c0_i32 = arith.constant 0 : i32
    %c0_i32_0 = arith.constant 0 : i32
    %c0_i32_1 = arith.constant 0 : i32
    return %c0_i32, %c0_i32_0 : i32, i32
  }
  func.func @transform_4(%arg0: i32) -> (i32, i32) {
    %c0_i32 = arith.constant 0 : i32
    %c0_i32_0 = arith.constant 0 : i32
    %c0_i32_1 = arith.constant 0 : i32
    return %c0_i32, %c0_i32_0 : i32, i32
  }
  func.func @transform_5(%arg0: i32) -> (i32, i32) {
    %c0_i32 = arith.constant 0 : i32
    %c0_i32_0 = arith.constant 0 : i32
    %c0_i32_1 = arith.constant 0 : i32
    return %c0_i32, %c0_i32_0 : i32, i32
  }
  func.func @transform_6(%arg0: i32) -> (i32, i32) {
    %c0_i32 = arith.constant 0 : i32
    %c0_i32_0 = arith.constant 0 : i32
    %c0_i32_1 = arith.constant 0 : i32
    return %c0_i32, %c0_i32_0 : i32, i32
  }
  func.func @transform_7(%arg0: i32) -> (i32, i32) {
    %c0_i32 = arith.constant 0 : i32
    %c0_i32_0 = arith.constant 0 : i32
    %c0_i32_1 = arith.constant 0 : i32
    return %c0_i32, %c0_i32_0 : i32, i32
  }
  func.func @transform_8(%arg0: i32) -> (i32, i32) {
    %c0_i32 = arith.constant 0 : i32
    %c0_i32_0 = arith.constant 0 : i32
    %c0_i32_1 = arith.constant 0 : i32
    return %c0_i32, %c0_i32_0 : i32, i32
  }
  func.func @transform_9(%arg0: i32) -> (i32, i32) {
    %c0_i32 = arith.constant 0 : i32
    %c0_i32_0 = arith.constant 0 : i32
    return %arg0, %c0_i32 : i32, i32
  }
}

</mosaic_0001>

<bundles_post_ra>
// kernel: autoencoder_forward.1
= control target key start
LH: loop header
LB: loop body
LE: loop exit
PB: predicated region body
PF: predicated region fallthrough
CT: control target
= control target key end

     0   :  { %14 = vsyncpa [#allocation3], 0  ;;  %s2669_s0 = inlined_call_operand.hbm [shape: f32[50,300], index: 0, kind: input, shape index: {}]   ;;  %s2670_s1 = inlined_call_operand.vmem [shape: bf16[300,256], index: 1, kind: input, shape index: {}]   ;;  %s2671_s2 = inlined_call_operand.vmem [shape: f32[1,256], index: 2, kind: input, shape index: {}]   ;;  %s2672_s3 = inlined_call_operand.vmem [shape: bf16[256,256], index: 3, kind: input, shape index: {}]   ;;  %s2673_s4 = inlined_call_operand.vmem [shape: f32[1,256], index: 4, kind: input, shape index: {}]   ;;  %s2674_s5 = inlined_call_operand.hbm [shape: bf16[256,256], index: 5, kind: input, shape index: {}]   ;;  %s2675_s6 = inlined_call_operand.vmem [shape: f32[1,256], index: 6, kind: input, shape index: {}]   ;;  %s2676_s7 = inlined_call_operand.vmem [shape: bf16[256,300], index: 7, kind: input, shape index: {}]   ;;  %s2677_s8 = inlined_call_operand.vmem [shape: f32[1,300], index: 8, kind: input, shape index: {}]   ;;  %s2678_s9 = inlined_call_operand.hbm [shape: f32[50,300], index: 9, kind: output, shape index: {}]  }
   0x1   :  { %15 = vsyncpa [#allocation6], 0 }
   0x2   :  { %16 = vsyncpa [#allocation4], 0  ;;  %s2131_s30 = smov [#allocation2]   ;;  %s2059_s13 = scalar_lea.hbm %s2669_s0, 2688 }
   0x3   :  { %s22_s10 = sshll.u32 %s2131_s30, 4  ;;  %p2060_p0 = scmp.ne.s32.totalorder %s2669_s0, %s2059_s13  ;;  %s23_s10 = int_to_ptr.vmem [resolvable:$true] %s22_s10 }
   0x4   :  { %p2063_p1 = scmp.lt.u32.totalorder %s2059_s13, %s2669_s0 }
   0x6   :  { %p2065_p2 = pnand %p2063_p1, %p2060_p0 }
   0x8   :  { %2068 = shalt.err (!%p2065_p2)
}
   0x9   :  { %s2069_s18 = scalar_lea.vmem %s23_s10, 2688  ;;  %p2074_p4 = scmp.lt.s32.totalorder %s23_s10, %s23_s10 }
   0xa   :  { %p2070_p3 = scmp.ne.s32.totalorder %s23_s10, %s2069_s18  ;;  %p2075_p5 = scmp.lt.s32.totalorder %s2069_s18, %s2069_s18 }
   0xc   :  { %p2076_p6 = por %p2075_p5, %p2074_p4 }
   0xe   :  { %p2077_p7 = pnand %p2076_p6, %p2070_p3 }
  0x10   :  { %2080 = shalt.err (!%p2077_p7)
}
  0x11   :  { %s2132_s19 = smov 384   ;;  %s2133_s20 = smov 24  }
  0x12   :  { %28 = dma.hbm_to_vmem [thread:$0]  %s2669_s0, 2688, %s23_s10, [#allocation3], %s2132_s19, %s2132_s19, %s2133_s20  }
  0x13   :  { %s2134_s23 = smov [#allocation5]   ;;  %s2081_s27 = scalar_lea.hbm %s2674_s5, 4096 }
  0x14   :  { %s42_s24 = sshll.u32 %s2134_s23, 4  ;;  %p2082_p8 = scmp.ne.s32.totalorder %s2674_s5, %s2081_s27  ;;  %s43_s24 = int_to_ptr.vmem [resolvable:$true] %s42_s24 }
  0x15   :  { %p2085_p9 = scmp.lt.u32.totalorder %s2081_s27, %s2674_s5 }
  0x17   :  { %p2087_p10 = pnand %p2085_p9, %p2082_p8 }
  0x19   :  { %2090 = shalt.err (!%p2087_p10)
}
  0x1a   :  { %s2091_s12 = scalar_lea.vmem %s43_s24, 4096  ;;  %p2096_p12 = scmp.lt.s32.totalorder %s43_s24, %s43_s24 }
  0x1b   :  { %p2092_p11 = scmp.ne.s32.totalorder %s43_s24, %s2091_s12  ;;  %p2097_p13 = scmp.lt.s32.totalorder %s2091_s12, %s2091_s12 }
  0x1d   :  { %p2098_p0 = por %p2097_p13, %p2096_p12 }
  0x1f   :  { %p2099_p1 = pnand %p2098_p0, %p2092_p11 }
  0x21   :  { %2102 = shalt.err (!%p2099_p1)
}
  0x22   :  { %s2135_s0 = smov 128   ;;  %s2136_s10 = smov 8  }
  0x23   :  { %48 = dma.hbm_to_vmem [thread:$0]  %s2674_s5, 4096, %s43_s24, [#allocation6], %s2135_s0, %s2135_s0, %s2136_s10  }
  0x24   :  { %2125 = dma.done.wait [#allocation3], 2688  }
  0x25   :  { %2126 = vsyncadd [#allocation3], 4294964608 }
  0x26   :  { %2127 = dma.done.wait [#allocation6], 4096  }
  0x27   :  { %2128 = vsyncadd [#allocation6], 4294963200  ;;  %v1842_v0 = vld [vmem:[%s2670_s1 + $0x4] ss:$8 sps:$4 sm:$0xff]   ;;  %v1844_v1 = vld [vmem:[%s2670_s1] ss:$8 sps:$4 sm:$0xff]  }
  0x28   :  { %353 = vmatprep.subr.bf16.mxu0 %v1842_v0  ;;  %v1845_v2 = vld [vmem:[%s2670_s1 + $0x14] ss:$8 sps:$4 sm:$0xff]   ;;  %v1847_v3 = vld [vmem:[%s2670_s1 + $0x10] ss:$8 sps:$4 sm:$0xff]   ;;  %v1848_v4 = vld [vmem:[%s2670_s1 + $0x24] ss:$8 sps:$4 sm:$0xff]  }
  0x29   :  { %354 = vmatpush1.bf16.msra.mxu0 %v1844_v1  ;;  %v1850_v5 = vld [vmem:[%s2670_s1 + $0x20] ss:$8 sps:$4 sm:$0xff]   ;;  %v1851_v6 = vld [vmem:[%s2670_s1 + $0x34] ss:$8 sps:$4 sm:$0xff]   ;;  %v1853_v7 = vld [vmem:[%s2670_s1 + $0x30] ss:$8 sps:$4 sm:$0xff]  }
  0x2a   :  { %355 = vmatprep.subr.bf16.mxu0 %v1845_v2  ;;  %v1854_v8 = vld [vmem:[%s2670_s1 + $0x44] ss:$8 sps:$4 sm:$0xff]   ;;  %v1856_v9 = vld [vmem:[%s2670_s1 + $0x40] ss:$8 sps:$4 sm:$0xff]   ;;  %v1857_v10 = vld [vmem:[%s2670_s1 + $0x54] ss:$8 sps:$4 sm:$0xff]  }
  0x2b   :  { %v1859_v11 = vld [vmem:[%s2670_s1 + $0x50] ss:$8 sps:$4 sm:$0xff]   ;;  %v1860_v12 = vld [vmem:[%s2670_s1 + $0x64] ss:$8 sps:$4 sm:$0xff]   ;;  %v1862_v16 = vld [vmem:[%s2670_s1 + $0x60] ss:$8 sps:$4 sm:$0xff]  }
  0x2c   :  { %v63_v13 = vld [vmem:[#allocation2 + $0x8] sm:$0xff]  ;;  %v66_v14 = vld [vmem:[#allocation2 + $0x20] sm:$0xff]  ;;  %v1863_v17 = vld [vmem:[%s2670_s1 + $0x74] ss:$8 sps:$4 sm:$0xff]   ;;  %vm346_vm0 = vcmask 1045504   ;;  %vm333_vm1 = vcmask 359424  }
  0x2d   :  { %356 = vmatpush1.bf16.msra.mxu0 %v1847_v3  ;;  %v84_v15 = vpack.c.bf16 %v66_v14, %v63_v13  ;;  %v1865_v18 = vld [vmem:[%s2670_s1 + $0x70] ss:$8 sps:$4 sm:$0xff]   ;;  %v1866_v19 = vld [vmem:[%s2670_s1 + $0x84] ss:$8 sps:$4 sm:$0xff]   ;;  %v1868_v20 = vld [vmem:[%s2670_s1 + $0x80] ss:$8 sps:$4 sm:$0xff]  }
  0x2e   :  { %357 = vmatprep.subr.bf16.mxu0 %v1848_v4  ;;  %v1869_v21 = vld [vmem:[%s2670_s1 + $0x94] ss:$8 sps:$4 sm:$0xff]   ;;  %v1899_v22 = vld [vmem:[%s2672_s3 + $0x4] ss:$8 sps:$4 sm:$0xff]   ;;  %v1901_v23 = vld [vmem:[%s2672_s3] ss:$8 sps:$4 sm:$0xff]  }
  0x2f   :  { %385 = vmatprep.mubr.bf16.mxu0 %v84_v15  ;;  %v1871_v24 = vld [vmem:[%s2670_s1 + $0x90] ss:$8 sps:$4 sm:$0xff]   ;;  %v1902_v25 = vld [vmem:[%s2672_s3 + $0x14] ss:$8 sps:$4 sm:$0xff]   ;;  %v1872_v26 = vld [vmem:[%s2670_s1 + $0xa4] ss:$8 sps:$4 sm:$0xff]   ;;  %721 = vmatprep.subr.bf16.mxu1 %v1899_v22 }
  0x30   :  { %722 = vmatpush1.bf16.msra.mxu1 %v1901_v23  ;;  %v1904_v27 = vld [vmem:[%s2672_s3 + $0x10] ss:$8 sps:$4 sm:$0xff]   ;;  %v1905_v28 = vld [vmem:[%s2672_s3 + $0x24] ss:$8 sps:$4 sm:$0xff]   ;;  %v1874_v29 = vld [vmem:[%s2670_s1 + $0xa0] ss:$8 sps:$4 sm:$0xff]  }
  0x31   :  { %358 = vmatpush1.bf16.msra.mxu0 %v1850_v5  ;;  %723 = vmatprep.subr.bf16.mxu1 %v1902_v25  ;;  %v1875_v30 = vld [vmem:[%s2670_s1 + $0xb4] ss:$8 sps:$4 sm:$0xff]   ;;  %v1907_v31 = vld [vmem:[%s2672_s3 + $0x20] ss:$8 sps:$4 sm:$0xff]   ;;  %v1877_v33 = vld [vmem:[%s2670_s1 + $0xb0] ss:$8 sps:$4 sm:$0xff]  }
  0x32   :  { %359 = vmatprep.subr.bf16.mxu0 %v1851_v6  ;;  %v1908_v32 = vld [vmem:[%s2672_s3 + $0x34] ss:$8 sps:$4 sm:$0xff]   ;;  %v1878_v34 = vld [vmem:[%s2670_s1 + $0xc4] ss:$8 sps:$4 sm:$0xff]   ;;  %v1910_v35 = vld [vmem:[%s2672_s3 + $0x30] ss:$8 sps:$4 sm:$0xff]  }
  0x33   :  { %v1911_v36 = vld [vmem:[%s2672_s3 + $0x44] ss:$8 sps:$4 sm:$0xff]   ;;  %v1880_v37 = vld [vmem:[%s2670_s1 + $0xc0] ss:$8 sps:$4 sm:$0xff]   ;;  %v1881_v38 = vld [vmem:[%s2670_s1 + $0xd4] ss:$8 sps:$4 sm:$0xff]  }
  0x34   :  { %724 = vmatpush1.bf16.msra.mxu1 %v1904_v27  ;;  %v1913_v39 = vld [vmem:[%s2672_s3 + $0x40] ss:$8 sps:$4 sm:$0xff]   ;;  %v1883_v40 = vld [vmem:[%s2670_s1 + $0xd0] ss:$8 sps:$4 sm:$0xff]   ;;  %v1914_v41 = vld [vmem:[%s2672_s3 + $0x54] ss:$8 sps:$4 sm:$0xff]  }
  0x35   :  { %360 = vmatpush1.bf16.msra.mxu0 %v1853_v7  ;;  %725 = vmatprep.subr.bf16.mxu1 %v1905_v28  ;;  %v1884_v42 = vld [vmem:[%s2670_s1 + $0xe4] ss:$8 sps:$4 sm:$0xff]   ;;  %v1916_v43 = vld [vmem:[%s2672_s3 + $0x50] ss:$8 sps:$4 sm:$0xff]   ;;  %v1886_v45 = vld [vmem:[%s2670_s1 + $0xe0] ss:$8 sps:$4 sm:$0xff]  }
  0x36   :  { %361 = vmatprep.subr.bf16.mxu0 %v1854_v8  ;;  %v1917_v44 = vld [vmem:[%s2672_s3 + $0x64] ss:$8 sps:$4 sm:$0xff]   ;;  %v1887_v46 = vld [vmem:[%s2670_s1 + $0xf4] ss:$8 sps:$4 sm:$0xff]   ;;  %v1919_v47 = vld [vmem:[%s2672_s3 + $0x60] ss:$8 sps:$4 sm:$0xff]  }
  0x37   :  { %v1920_v48 = vld [vmem:[%s2672_s3 + $0x74] ss:$8 sps:$4 sm:$0xff]   ;;  %v1889_v49 = vld [vmem:[%s2670_s1 + $0xf0] ss:$8 sps:$4 sm:$0xff]   ;;  %v62_v50 = vld [vmem:[#allocation2] sm:$0xff]  ;;  %vm1589_vm2 = vcmask 353280  }
  0x38   :  { %726 = vmatpush1.bf16.msra.mxu1 %v1907_v31  ;;  %v65_v51 = vld [vmem:[#allocation2 + $0x18] sm:$0xff]  ;;  %v1892_v52 = vld [vmem:[%s2670_s1 + $0x104] ss:$8 sps:$4 sm:$0xff]   ;;  %v72_v54 = vld [vmem:[#allocation2 + $0x50] sm:$0xff] }
  0x39   :  { %362 = vmatpush1.bf16.msra.mxu0 %v1856_v9  ;;  %727 = vmatprep.subr.bf16.mxu1 %v1908_v32  ;;  %v69_v53 = vld [vmem:[#allocation2 + $0x38] sm:$0xff]  ;;  %v1923_v56 = vld [vmem:[%s2672_s3 + $0x84] ss:$8 sps:$4 sm:$0xff]   ;;  %v1890_v57 = vld [vmem:[%s2670_s1 + $0x100] ss:$8 sps:$4 sm:$0xff]   ;;  %v83_v58 = vpack.c.bf16 %v65_v51, %v62_v50 }
  0x3a   :  { %363 = vmatprep.subr.bf16.mxu0 %v1857_v10  ;;  %v1922_v55 = vld [vmem:[%s2672_s3 + $0x70] ss:$8 sps:$4 sm:$0xff]   ;;  %v1895_v59 = vld [vmem:[%s2670_s1 + $0x114] ss:$8 sps:$4 sm:$0xff]   ;;  %v1925_v60 = vld [vmem:[%s2672_s3 + $0x80] ss:$8 sps:$4 sm:$0xff]   ;;  %v87_v61 = vpack.c.bf16 %v72_v54, %v69_v53 }
  0x3b   :  { %v1926_v62 = vld [vmem:[%s2672_s3 + $0x94] ss:$8 sps:$4 sm:$0xff]   ;;  %v71_v0 = vld [vmem:[#allocation2 + $0x48] sm:$0xff]  ;;  %v1893_v1 = vld [vmem:[%s2670_s1 + $0x110] ss:$8 sps:$4 sm:$0xff]  }
  0x3c   :  { %728 = vmatpush1.bf16.msra.mxu1 %v1910_v35  ;;  %v68_v63 = vld [vmem:[#allocation2 + $0x30] sm:$0xff]  ;;  %v75_v2 = vld [vmem:[#allocation2 + $0x68] sm:$0xff]  ;;  %v78_v3 = vld [vmem:[#allocation2 + $0x80] sm:$0xff] }
  0x3d   :  { %364 = vmatpush1.bf16.msra.mxu0 %v1859_v11  ;;  %729 = vmatprep.subr.bf16.mxu1 %v1911_v36  ;;  %v1896_v4 = vld [vmem:[%s2670_s1 + $0x124] ss:$8 sps:$4 sm:$0x3f]   ;;  %v1898_v5 = vld [vmem:[%s2670_s1 + $0x120] ss:$8 sps:$4 sm:$0x3f]   ;;  %v86_v8 = vpack.c.bf16 %v71_v0, %v68_v63  ;;  %v90_v10 = vpack.c.bf16 %v78_v3, %v75_v2 }
  0x3e   :  { %365 = vmatprep.subr.bf16.mxu0 %v1860_v12  ;;  %v1928_v6 = vld [vmem:[%s2672_s3 + $0x90] ss:$8 sps:$4 sm:$0xff]   ;;  %v1929_v7 = vld [vmem:[%s2672_s3 + $0xa4] ss:$8 sps:$4 sm:$0xff]   ;;  %v1931_v9 = vld [vmem:[%s2672_s3 + $0xa0] ss:$8 sps:$4 sm:$0xff]  }
  0x3f   :  { %v1932_v11 = vld [vmem:[%s2672_s3 + $0xb4] ss:$8 sps:$4 sm:$0xff]   ;;  %v348_v12 = vsel %vm346_vm0, %v1898_v5, 0  ;;  %v74_v13 = vld [vmem:[#allocation2 + $0x60] sm:$0xff]  ;;  %v81_v15 = vld [vmem:[#allocation2 + $0x98] sm:$0x3] }
  0x40   :  { %730 = vmatpush1.bf16.msra.mxu1 %v1913_v39  ;;  %v77_v14 = vld [vmem:[#allocation2 + $0x78] sm:$0xff]  ;;  %v80_v22 = vld [vmem:[#allocation2 + $0x90] sm:$0x3]  ;;  %v70_v28 = vld [vmem:[#allocation2 + $0x40] sm:$0xff] }
  0x41   :  { %366 = vmatpush1.bf16.msra.mxu0 %v1862_v16  ;;  %731 = vmatprep.subr.bf16.mxu1 %v1914_v41  ;;  %v1934_v16 = vld [vmem:[%s2672_s3 + $0xb0] ss:$8 sps:$4 sm:$0xff]   ;;  %v92_v23 = vpack.c.bf16 %v80_v22, %v80_v22  ;;  %v79_v32 = vld [vmem:[#allocation2 + $0x88] sm:$0xff]  ;;  %v1944_v39 = vld [vmem:[%s2672_s3 + $0xf4] ss:$8 sps:$4 sm:$0xff]  }
  0x42   :  { %367 = vmatprep.subr.bf16.mxu0 %v1863_v17  ;;  %v1935_v17 = vld [vmem:[%s2672_s3 + $0xc4] ss:$8 sps:$4 sm:$0xff]   ;;  %v64_v25 = vld [vmem:[#allocation2 + $0x10] sm:$0xff] }
  0x43   :  { %v76_v31 = vld [vmem:[#allocation2 + $0x70] sm:$0xff]  ;;  %v1952_v3 = vld [vmem:[#allocation5 + $0x14] ss:$8 sps:$4 sm:$0xff]  }
  0x44   :  { %732 = vmatpush1.bf16.msra.mxu1 %v1916_v43  ;;  %v1940_v36 = vld [vmem:[%s2672_s3 + $0xd0] ss:$8 sps:$4 sm:$0xff]   ;;  %v1949_v41 = vld [vmem:[#allocation5 + $0x4] ss:$8 sps:$4 sm:$0xff]  }
  0x45   :  { %368 = vmatpush1.bf16.msra.mxu0 %v1865_v18  ;;  %733 = vmatprep.subr.bf16.mxu1 %v1917_v44  ;;  %v89_v18 = vpack.c.bf16 %v77_v14, %v74_v13  ;;  %v1947_v0 = vld [vmem:[#allocation5] ss:$8 sps:$4 sm:$0xff]  }
  0x46   :  { %369 = vmatprep.subr.bf16.mxu0 %v1866_v19  ;;  %v1937_v19 = vld [vmem:[%s2672_s3 + $0xc0] ss:$8 sps:$4 sm:$0xff]  }
  0x48   :  { %734 = vmatpush1.bf16.msra.mxu1 %v1919_v47 }
  0x49   :  { %370 = vmatpush1.bf16.msra.mxu0 %v1868_v20  ;;  %735 = vmatprep.subr.bf16.mxu1 %v1920_v48  ;;  %v93_v20 = vpack.c.bf16 %v81_v15, %v81_v15 }
  0x4a   :  { %371 = vmatprep.subr.bf16.mxu0 %v1869_v21  ;;  %v1938_v21 = vld [vmem:[%s2672_s3 + $0xd4] ss:$8 sps:$4 sm:$0xff]  }
  0x4c   :  { %736 = vmatpush1.bf16.msra.mxu1 %v1922_v55 }
  0x4d   :  { %372 = vmatpush1.bf16.msra.mxu0 %v1871_v24  ;;  %737 = vmatprep.subr.bf16.mxu1 %v1923_v56  ;;  %v2137_v24 = vmov 0  }
  0x4e   :  { %373 = vmatprep.subr.bf16.mxu0 %v1872_v26  ;;  %v67_v26 = vld [vmem:[#allocation2 + $0x28] sm:$0xff] }
  0x4f   :  { %v85_v27 = vpack.c.bf16 %v67_v26, %v64_v25 }
  0x50   :  { %738 = vmatpush1.bf16.msra.mxu1 %v1925_v60 }
  0x51   :  { %374 = vmatpush1.bf16.msra.mxu0 %v1874_v29  ;;  %739 = vmatprep.subr.bf16.mxu1 %v1926_v62  ;;  %v73_v29 = vld [vmem:[#allocation2 + $0x58] sm:$0xff] }
  0x52   :  { %375 = vmatprep.subr.bf16.mxu0 %v1875_v30  ;;  %v88_v30 = vpack.c.bf16 %v73_v29, %v70_v28 }
  0x54   :  { %740 = vmatpush1.bf16.msra.mxu1 %v1928_v6 }
  0x55   :  { %376 = vmatpush1.bf16.msra.mxu0 %v1877_v33  ;;  %741 = vmatprep.subr.bf16.mxu1 %v1929_v7  ;;  %v91_v33 = vpack.c.bf16 %v79_v32, %v76_v31 }
  0x56   :  { %377 = vmatprep.subr.bf16.mxu0 %v1878_v34  ;;  %v82_v34 = vld [vmem:[#allocation2 + $0xa0] sm:$0x3] }
  0x57   :  { %v94_v35 = vpack.c.bf16 %v82_v34, %v82_v34 }
  0x58   :  { %742 = vmatpush1.bf16.msra.mxu1 %v1931_v9  ;;  %v1950_v9 = vld [vmem:[#allocation5 + $0x10] ss:$8 sps:$4 sm:$0xff]  }
  0x59   :  { %378 = vmatpush1.bf16.msra.mxu0 %v1880_v37  ;;  %743 = vmatprep.subr.bf16.mxu1 %v1932_v11  ;;  %v1941_v37 = vld [vmem:[%s2672_s3 + $0xe4] ss:$8 sps:$4 sm:$0xff]  }
  0x5a   :  { %379 = vmatprep.subr.bf16.mxu0 %v1881_v38  ;;  %v1943_v38 = vld [vmem:[%s2672_s3 + $0xe0] ss:$8 sps:$4 sm:$0xff]  }
  0x5c   :  { %744 = vmatpush1.bf16.msra.mxu1 %v1934_v16 }
  0x5d   :  { %380 = vmatpush1.bf16.msra.mxu0 %v1883_v40  ;;  %745 = vmatprep.subr.bf16.mxu1 %v1935_v17  ;;  %v1946_v40 = vld [vmem:[%s2672_s3 + $0xf0] ss:$8 sps:$4 sm:$0xff]  }
  0x5e   :  { %381 = vmatprep.subr.bf16.mxu0 %v1884_v42  ;;  %v135_v42 = vlaneseq }
  0x60   :  { %746 = vmatpush1.bf16.msra.mxu1 %v1937_v19  ;;  %v2430_v43 = vshrl.u32 %v135_v42, 7 }
  0x61   :  { %382 = vmatpush1.bf16.msra.mxu0 %v1886_v45  ;;  %747 = vmatprep.subr.bf16.mxu1 %v1938_v21  ;;  %v133_v45 = vld [vmem:[%s2671_s2] sm:$0x3]  ;;  %v1958_v21 = vld [vmem:[#allocation5 + $0x34] ss:$8 sps:$4 sm:$0xff]  }
  0x62   :  { %383 = vmatprep.subr.bf16.mxu0 %v1887_v46  ;;  %v2433_v44 = vsub.s32 0, %v2430_v43  ;;  %v2439_v46 = vsub.s32 1, %v2430_v43 }
  0x64   :  { %748 = vmatpush1.bf16.msra.mxu1 %v1940_v36  ;;  %v2442_v47 = vrot.slane %v133_v45, %v2433_v44  ;;  %v2445_v48 = vrot.slane %v133_v45, %v2439_v46  ;;  %v1959_v36 = vld [vmem:[#allocation5 + $0x40] ss:$8 sps:$4 sm:$0xff]  }
  0x65   :  { %384 = vmatpush1.bf16.msra.mxu0 %v1889_v49  ;;  %749 = vmatprep.subr.bf16.mxu1 %v1941_v37 }
  0x66   :  { %424 = vmatprep.subr.bf16.mxu0 %v1892_v52 }
  0x68   :  { %386 = vmatmul.mubr.bf16.vlgmr.msra.gmra.mrb[0].mxu0 %v83_v58  ;;  %750 = vmatpush1.bf16.msra.mxu1 %v1943_v38 }
  0x69   :  { %425 = vmatpush1.bf16.msra.mxu0 %v1890_v57  ;;  %395 = vmatprep.mubr.bf16.mxu0 %v87_v61 }
  0x6a   :  { %426 = vmatprep.subr.bf16.mxu0 %v1895_v59  ;;  %751 = vmatprep.subr.bf16.mxu1 %v1944_v39  ;;  %v1964_v39 = vld [vmem:[#allocation5 + $0x54] ss:$8 sps:$4 sm:$0xff]  }
  0x6c   :  { %752 = vmatpush1.bf16.msra.mxu1 %v1946_v40 }
  0x6d   :  { %427 = vmatpush1.bf16.msra.mxu0 %v1893_v1  ;;  %1004 = vmatprep.subr.bf16.mxu1 %v1949_v41 }
  0x6e   :  { %1647 = vmatprep.subr.msk.bf16.mxu0 %vm346_vm0, %v1896_v4 }
  0x70   :  { %396 = vmatmul.mubr.bf16.gmra.mrb[4].mxu0 %v86_v8 }
  0x71   :  { %405 = vmatprep.mubr.bf16.mxu0 %v90_v10  ;;  %429 = vmatpush1.bf16.msra.mxu0 %v348_v12  ;;  %v1955_v12 = vld [vmem:[#allocation5 + $0x24] ss:$8 sps:$4 sm:$0xff]  }
  0x78   :  { %406 = vmatmul.mubr.bf16.gmra.mrb[8].mxu0 %v89_v18  ;;  %v1953_v18 = vld [vmem:[#allocation5 + $0x20] ss:$8 sps:$4 sm:$0xff]  }
  0x79   :  { %415 = vmatprep.mubr.bf16.mxu0 %v93_v20 }
  0x80   :  { %416 = vmatmul.mubr.bf16.gmra.mrb[12].mxu0 %v92_v23 }
  0x81   :  { %456 = vmatprep.mubr.bf16.mxu0 %v2137_v24 }
  0x88   :  { %1648 = vmatmul.mubr.msk.bf16.vlgmr.msra.gmra.mrb[0].mxu0 %vm333_vm1, %v85_v27  ;;  %v1956_v27 = vld [vmem:[#allocation5 + $0x30] ss:$8 sps:$4 sm:$0xff]  }
  0x89   :  { %466 = vmatprep.mubr.bf16.mxu0 %v2137_v24 }
  0x90   :  { %1649 = vmatmul.mubr.msk.bf16.gmra.mrb[4].mxu0 %vm333_vm1, %v88_v30  ;;  %v1961_v30 = vld [vmem:[#allocation5 + $0x44] ss:$8 sps:$4 sm:$0xff]  }
  0x91   :  { %476 = vmatprep.mubr.bf16.mxu0 %v2137_v24 }
  0x98   :  { %1650 = vmatmul.mubr.msk.bf16.gmra.mrb[8].mxu0 %vm333_vm1, %v91_v33 }
  0x99   :  { %486 = vmatprep.mubr.bf16.mxu0 %v2137_v24 }
  0xa0   :  { %1651 = vmatmul.mubr.msk.bf16.gmra.mrb[12].mxu0 %vm333_vm1, %v94_v35 }
 0x15b   :  { %v458_v49 = vpop.f32.mrb[0].mxu0 }
 0x15c   :  { %v1804_v50 = vadd.f32 %v458_v49, %v2442_v47  ;;  %v460_v51 = vpop.f32.mrb[1].mxu0  ;;  %v1962_v49 = vld [vmem:[#allocation5 + $0x50] ss:$8 sps:$4 sm:$0xff]  }
 0x15d   :  { %v1805_v52 = vadd.f32 %v460_v51, %v2445_v48  ;;  %v462_v53 = vpop.f32.mrb[2].mxu0  ;;  %v1967_v51 = vld [vmem:[#allocation5 + $0x64] ss:$8 sps:$4 sm:$0xff]  }
 0x15e   :  { %v1806_v54 = vadd.f32 %v462_v53, %v2442_v47  ;;  %v464_v55 = vpop.f32.mrb[3].mxu0  ;;  %v495_v57 = vmax.f32 %v1804_v50, 0.0  ;;  %v1965_v53 = vld [vmem:[#allocation5 + $0x60] ss:$8 sps:$4 sm:$0xff]  }
 0x15f   :  { %v1807_v56 = vadd.f32 %v464_v55, %v2445_v48  ;;  %v496_v59 = vmax.f32 %v1805_v52, 0.0  ;;  %v1973_v55 = vld [vmem:[#allocation5 + $0x84] ss:$8 sps:$4 sm:$0xff]  }
 0x160   :  { %v497_v58 = vmax.f32 %v1806_v54, 0.0  ;;  %v1970_v54 = vld [vmem:[#allocation5 + $0x74] ss:$8 sps:$4 sm:$0xff]  }
 0x161   :  { %v498_v60 = vmax.f32 %v1807_v56, 0.0  ;;  %v1971_v56 = vld [vmem:[#allocation5 + $0x80] ss:$8 sps:$4 sm:$0xff]  }
 0x162   :  { %v509_v61 = vpack.c.bf16 %v497_v58, %v495_v57  ;;  %v1976_v57 = vld [vmem:[#allocation5 + $0x94] ss:$8 sps:$4 sm:$0xff]   ;;  %v1974_v58 = vld [vmem:[#allocation5 + $0x90] ss:$8 sps:$4 sm:$0xff]  }
 0x163   :  { %v468_v62 = vpop.f32.mrb[4].mxu0  ;;  %v510_v63 = vpack.c.bf16 %v498_v60, %v496_v59  ;;  %v1979_v59 = vld [vmem:[#allocation5 + $0xa4] ss:$8 sps:$4 sm:$0xff]   ;;  %v1977_v60 = vld [vmem:[#allocation5 + $0xa0] ss:$8 sps:$4 sm:$0xff]  }
 0x164   :  { %v1808_v1 = vadd.f32 %v468_v62, %v2442_v47  ;;  %v470_v2 = vpop.f32.mrb[5].mxu0  ;;  %v1980_v62 = vld [vmem:[#allocation5 + $0xb0] ss:$8 sps:$4 sm:$0xff]  }
 0x165   :  { %v1809_v4 = vadd.f32 %v470_v2, %v2445_v48  ;;  %v472_v5 = vpop.f32.mrb[6].mxu0  ;;  %753 = vmatprep.mubr.bf16.mxu1 %v510_v63  ;;  %v1985_v63 = vld [vmem:[#allocation5 + $0xc4] ss:$8 sps:$4 sm:$0xff]   ;;  %v1986_v2 = vld [vmem:[#allocation5 + $0xd0] ss:$8 sps:$4 sm:$0xff]  }
 0x166   :  { %v1810_v6 = vadd.f32 %v472_v5, %v2442_v47  ;;  %v474_v7 = vpop.f32.mrb[7].mxu0  ;;  %754 = vmatmul.mubr.bf16.vlgmr.msra.gmra.mrb[0].mxu1 %v509_v61  ;;  %v499_v10 = vmax.f32 %v1808_v1, 0.0  ;;  %v1982_v61 = vld [vmem:[#allocation5 + $0xb4] ss:$8 sps:$4 sm:$0xff]  }
 0x167   :  { %v1811_v8 = vadd.f32 %v474_v7, %v2445_v48  ;;  %1005 = vmatpush1.bf16.msra.mxu1 %v1947_v0  ;;  %v500_v13 = vmax.f32 %v1809_v4, 0.0  ;;  %v1983_v0 = vld [vmem:[#allocation5 + $0xc0] ss:$8 sps:$4 sm:$0xff]   ;;  %v1988_v1 = vld [vmem:[#allocation5 + $0xd4] ss:$8 sps:$4 sm:$0xff]  }
 0x168   :  { %v501_v11 = vmax.f32 %v1810_v6, 0.0  ;;  %1006 = vmatprep.subr.bf16.mxu1 %v1952_v3  ;;  %v1991_v3 = vld [vmem:[#allocation5 + $0xe4] ss:$8 sps:$4 sm:$0xff]   ;;  %v1989_v4 = vld [vmem:[#allocation5 + $0xe0] ss:$8 sps:$4 sm:$0xff]  }
 0x169   :  { %v502_v14 = vmax.f32 %v1811_v8, 0.0  ;;  %v1994_v5 = vld [vmem:[#allocation5 + $0xf4] ss:$8 sps:$4 sm:$0xff]   ;;  %v1992_v6 = vld [vmem:[#allocation5 + $0xf0] ss:$8 sps:$4 sm:$0xff]  }
 0x16a   :  { %v511_v15 = vpack.c.bf16 %v501_v11, %v499_v10  ;;  %v1995_v7 = vld [vmem:[%s2676_s7] ss:$12 sps:$4 sm:$0xff]   ;;  %v1997_v8 = vld [vmem:[%s2676_s7 + $0x4] ss:$12 sps:$4 sm:$0xff]  }
 0x16b   :  { %v512_v16 = vpack.c.bf16 %v502_v14, %v500_v13  ;;  %v478_v17 = vpop.f32.mrb[8].mxu0  ;;  %1007 = vmatpush1.bf16.msra.mxu1 %v1950_v9  ;;  %v2000_v9 = vld [vmem:[%s2676_s7 + $0x1c] ss:$12 sps:$4 sm:$0xff]   ;;  %1434 = vmatprep.subr.bf16.mxu0 %v1997_v8  ;;  %v1998_v10 = vld [vmem:[%s2676_s7 + $0x18] ss:$12 sps:$4 sm:$0xff]  }
 0x16c   :  { %v1812_v19 = vadd.f32 %v478_v17, %v2442_v47  ;;  %v480_v20 = vpop.f32.mrb[9].mxu0  ;;  %1008 = vmatprep.subr.bf16.mxu1 %v1955_v12  ;;  %1435 = vmatpush1.bf16.msra.mxu0 %v1995_v7  ;;  %v2003_v11 = vld [vmem:[%s2676_s7 + $0x34] ss:$12 sps:$4 sm:$0xff]   ;;  %v2001_v13 = vld [vmem:[%s2676_s7 + $0x30] ss:$12 sps:$4 sm:$0xff]  }
 0x16d   :  { %v1813_v22 = vadd.f32 %v480_v20, %v2445_v48  ;;  %v482_v23 = vpop.f32.mrb[10].mxu0  ;;  %763 = vmatprep.mubr.bf16.mxu1 %v512_v16  ;;  %1436 = vmatprep.subr.bf16.mxu0 %v2000_v9  ;;  %v2022_v12 = vld [vmem:[%s2676_s7 + $0xc8] ss:$12 sps:$4 sm:$0xff]   ;;  %v2006_v14 = vld [vmem:[%s2676_s7 + $0x4c] ss:$12 sps:$4 sm:$0xff]  }
 0x16e   :  { %v1814_v24 = vadd.f32 %v482_v23, %v2442_v47  ;;  %v484_v25 = vpop.f32.mrb[11].mxu0  ;;  %764 = vmatmul.mubr.bf16.gmra.mrb[4].mxu1 %v511_v15  ;;  %v503_v28 = vmax.f32 %v1812_v19, 0.0  ;;  %v2004_v15 = vld [vmem:[%s2676_s7 + $0x48] ss:$12 sps:$4 sm:$0xff]   ;;  %v2009_v16 = vld [vmem:[%s2676_s7 + $0x64] ss:$12 sps:$4 sm:$0xff]  }
 0x16f   :  { %v1815_v26 = vadd.f32 %v484_v25, %v2445_v48  ;;  %1009 = vmatpush1.bf16.msra.mxu1 %v1953_v18  ;;  %v504_v31 = vmax.f32 %v1813_v22, 0.0  ;;  %v2007_v17 = vld [vmem:[%s2676_s7 + $0x60] ss:$12 sps:$4 sm:$0xff]   ;;  %v2012_v18 = vld [vmem:[%s2676_s7 + $0x7c] ss:$12 sps:$4 sm:$0xff]  }
 0x170   :  { %v505_v29 = vmax.f32 %v1814_v24, 0.0  ;;  %1010 = vmatprep.subr.bf16.mxu1 %v1958_v21  ;;  %1437 = vmatpush1.bf16.msra.mxu0 %v1998_v10  ;;  %v2010_v19 = vld [vmem:[%s2676_s7 + $0x78] ss:$12 sps:$4 sm:$0xff]   ;;  %v2015_v20 = vld [vmem:[%s2676_s7 + $0x94] ss:$12 sps:$4 sm:$0xff]  }
 0x171   :  { %v506_v32 = vmax.f32 %v1815_v26, 0.0  ;;  %1438 = vmatprep.subr.bf16.mxu0 %v2003_v11  ;;  %v2013_v21 = vld [vmem:[%s2676_s7 + $0x90] ss:$12 sps:$4 sm:$0xff]   ;;  %v2018_v22 = vld [vmem:[%s2676_s7 + $0xac] ss:$12 sps:$4 sm:$0xff]  }
 0x172   :  { %v513_v33 = vpack.c.bf16 %v505_v29, %v503_v28  ;;  %v2016_v23 = vld [vmem:[%s2676_s7 + $0xa8] ss:$12 sps:$4 sm:$0xff]   ;;  %v2021_v24 = vld [vmem:[%s2676_s7 + $0xc4] ss:$12 sps:$4 sm:$0xff]   ;;  %v2019_v25 = vld [vmem:[%s2676_s7 + $0xc0] ss:$12 sps:$4 sm:$0xff]  }
 0x173   :  { %v514_v34 = vpack.c.bf16 %v506_v32, %v504_v31  ;;  %v488_v35 = vpop.f32.mrb[12].mxu0  ;;  %1011 = vmatpush1.bf16.msra.mxu1 %v1956_v27  ;;  %v2026_v26 = vld [vmem:[%s2676_s7 + $0xdc] ss:$12 sps:$4 sm:$0xff]   ;;  %v2024_v27 = vld [vmem:[%s2676_s7 + $0xd8] ss:$12 sps:$4 sm:$0xff]  }
 0x174   :  { %v1816_v37 = vadd.f32 %v488_v35, %v2442_v47  ;;  %v490_v38 = vpop.f32.mrb[13].mxu0  ;;  %1012 = vmatprep.subr.bf16.mxu1 %v1961_v30  ;;  %1439 = vmatpush1.bf16.msra.mxu0 %v2001_v13  ;;  %v2031_v28 = vld [vmem:[%s2676_s7 + $0xf4] ss:$12 sps:$4 sm:$0xff]   ;;  %v2029_v29 = vld [vmem:[%s2676_s7 + $0xf0] ss:$12 sps:$4 sm:$0xff]  }
 0x175   :  { %v1817_v40 = vadd.f32 %v490_v38, %v2445_v48  ;;  %v492_v41 = vpop.f32.mrb[14].mxu0  ;;  %773 = vmatprep.mubr.bf16.mxu1 %v514_v34  ;;  %v1968_v48 = vld [vmem:[#allocation5 + $0x70] ss:$8 sps:$4 sm:$0xff]   ;;  %1440 = vmatprep.subr.bf16.mxu0 %v2006_v14  ;;  %v2034_v31 = vld [vmem:[%s2676_s7 + $0x108] ss:$12 sps:$4 sm:$0xff]  }
 0x176   :  { %v493_v42 = vpop.f32.mrb[15].mxu0  ;;  %774 = vmatmul.mubr.bf16.gmra.mrb[8].mxu1 %v513_v33  ;;  %v507_v50 = vmax.f32 %v1816_v37, 0.0  ;;  %v2036_v30 = vld [vmem:[%s2676_s7 + $0x10c] ss:$12 sps:$4 sm:$0xff]   ;;  %v2041_v32 = vld [vmem:[%s2676_s7 + $0x124] ss:$12 sps:$4 sm:$0xff]  }
 0x177   :  { %v508_v45 = vmax.f32 %v1817_v40, 0.0  ;;  %1013 = vmatpush1.bf16.msra.mxu1 %v1959_v36  ;;  %v2039_v33 = vld [vmem:[%s2676_s7 + $0x120] ss:$12 sps:$4 sm:$0xff]   ;;  %v2046_v34 = vld [vmem:[%s2676_s7 + $0x13c] ss:$12 sps:$4 sm:$0xff]  }
 0x178   :  { %1014 = vmatprep.subr.bf16.mxu1 %v1964_v39  ;;  %v515_v47 = vpack.c.bf16 %v507_v50, %v507_v50  ;;  %1441 = vmatpush1.bf16.msra.mxu0 %v2004_v15  ;;  %v2044_v35 = vld [vmem:[%s2676_s7 + $0x138] ss:$12 sps:$4 sm:$0xff]   ;;  %v549_v36 = vld [vmem:[%s2673_s4] sm:$0x3]  ;;  %v2038_v7 = vld [vmem:[%s2676_s7 + $0x50] ss:$12 sps:$4 sm:$0xff]  }
 0x179   :  { %v516_v52 = vpack.c.bf16 %v508_v45, %v508_v45  ;;  %1442 = vmatprep.subr.bf16.mxu0 %v2009_v16  ;;  %v554_v37 = vrot.slane %v549_v36, %v2433_v44  ;;  %v558_v39 = vrot.slane %v549_v36, %v2439_v46  ;;  %v2042_v11 = vld [vmem:[%s2676_s7 + $0x128] ss:$12 sps:$4 sm:$0xff]  }
 0x17a   :  { %v2043_v16 = vld [vmem:[%s2676_s7 + $0x68] ss:$12 sps:$4 sm:$0xff]  }
 0x17b   :  { %783 = vmatprep.mubr.bf16.mxu1 %v516_v52  ;;  %1015 = vmatpush1.bf16.msra.mxu1 %v1962_v49 }
 0x17c   :  { %1016 = vmatprep.subr.bf16.mxu1 %v1967_v51  ;;  %1443 = vmatpush1.bf16.msra.mxu0 %v2007_v17  ;;  %v2047_v17 = vld [vmem:[%s2676_s7 + $0x140] ss:$12 sps:$4 sm:$0xff]  }
 0x17d   :  { %1444 = vmatprep.subr.bf16.mxu0 %v2012_v18 }
 0x17e   :  { %784 = vmatmul.mubr.bf16.gmra.mrb[12].mxu1 %v515_v47  ;;  %v2023_v47 = vld [vmem:[%s2676_s7 + $0x8] ss:$12 sps:$4 sm:$0xff]  }
 0x17f   :  { %1017 = vmatpush1.bf16.msra.mxu1 %v1965_v53 }
 0x180   :  { %1018 = vmatprep.subr.bf16.mxu1 %v1970_v54  ;;  %1445 = vmatpush1.bf16.msra.mxu0 %v2010_v19  ;;  %v2027_v54 = vld [vmem:[%s2676_s7 + $0xe0] ss:$12 sps:$4 sm:$0xff]  }
 0x181   :  { %1446 = vmatprep.subr.bf16.mxu0 %v2015_v20 }
 0x183   :  { %1019 = vmatpush1.bf16.msra.mxu1 %v1968_v48 }
 0x184   :  { %1020 = vmatprep.subr.bf16.mxu1 %v1973_v55  ;;  %1447 = vmatpush1.bf16.msra.mxu0 %v2013_v21 }
 0x185   :  { %1448 = vmatprep.subr.bf16.mxu0 %v2018_v22 }
 0x187   :  { %1021 = vmatpush1.bf16.msra.mxu1 %v1971_v56 }
 0x188   :  { %1022 = vmatprep.subr.bf16.mxu1 %v1976_v57  ;;  %1449 = vmatpush1.bf16.msra.mxu0 %v2016_v23  ;;  %v2028_v57 = vld [vmem:[%s2676_s7 + $0x20] ss:$12 sps:$4 sm:$0xff]  }
 0x189   :  { %1450 = vmatprep.subr.bf16.mxu0 %v2021_v24 }
 0x18b   :  { %1023 = vmatpush1.bf16.msra.mxu1 %v1974_v58 }
 0x18c   :  { %1024 = vmatprep.subr.bf16.mxu1 %v1979_v59  ;;  %1451 = vmatpush1.bf16.msra.mxu0 %v2019_v25 }
 0x18d   :  { %1452 = vmatprep.subr.bf16.mxu0 %v2026_v26  ;;  %v2048_v26 = vld [vmem:[%s2676_s7 + $0x80] ss:$12 sps:$4 sm:$0xff]  }
 0x18f   :  { %1025 = vmatpush1.bf16.msra.mxu1 %v1977_v60 }
 0x190   :  { %1026 = vmatprep.subr.bf16.mxu1 %v1982_v61  ;;  %1453 = vmatpush1.bf16.msra.mxu0 %v2024_v27  ;;  %v2032_v61 = vld [vmem:[%s2676_s7 + $0xf8] ss:$12 sps:$4 sm:$0xff]   ;;  %v2051_v27 = vld [vmem:[%s2676_s7 + $0x154] ss:$12 sps:$4 sm:$0xff]  }
 0x191   :  { %1454 = vmatprep.subr.bf16.mxu0 %v2031_v28  ;;  %v2052_v28 = vld [vmem:[%s2676_s7 + $0x158] ss:$12 sps:$4 sm:$0xff]  }
 0x193   :  { %1027 = vmatpush1.bf16.msra.mxu1 %v1980_v62 }
 0x194   :  { %1028 = vmatprep.subr.bf16.mxu1 %v1985_v63  ;;  %1455 = vmatpush1.bf16.msra.mxu0 %v2029_v29  ;;  %v2049_v29 = vld [vmem:[%s2676_s7 + $0x150] ss:$12 sps:$4 sm:$0xff]  }
 0x195   :  { %1456 = vmatprep.subr.bf16.mxu0 %v2036_v30  ;;  %v2053_v30 = vld [vmem:[%s2676_s7 + $0x98] ss:$12 sps:$4 sm:$0xff]  }
 0x197   :  { %1029 = vmatpush1.bf16.msra.mxu1 %v1983_v0 }
 0x198   :  { %1030 = vmatprep.subr.bf16.mxu1 %v1988_v1  ;;  %1457 = vmatpush1.bf16.msra.mxu0 %v2034_v31  ;;  %v2056_v31 = vld [vmem:[%s2676_s7 + $0x16c] ss:$12 sps:$4 sm:$0xff]  }
 0x199   :  { %1458 = vmatprep.subr.bf16.mxu0 %v2041_v32  ;;  %v2057_v32 = vld [vmem:[%s2676_s7 + $0x170] ss:$12 sps:$4 sm:$0xff]  }
 0x19b   :  { %1031 = vmatpush1.bf16.msra.mxu1 %v1986_v2  ;;  %v2033_v2 = vld [vmem:[%s2676_s7 + $0x38] ss:$12 sps:$4 sm:$0xff]  }
 0x19c   :  { %1032 = vmatprep.subr.bf16.mxu1 %v1991_v3  ;;  %1459 = vmatpush1.bf16.msra.mxu0 %v2039_v33  ;;  %v2037_v3 = vld [vmem:[%s2676_s7 + $0x110] ss:$12 sps:$4 sm:$0xff]   ;;  %v2054_v33 = vld [vmem:[%s2676_s7 + $0x168] ss:$12 sps:$4 sm:$0xff]  }
 0x19d   :  { %1460 = vmatprep.subr.bf16.mxu0 %v2046_v34  ;;  %v2058_v34 = vld [vmem:[%s2676_s7 + $0xb0] ss:$12 sps:$4 sm:$0xff]  }
 0x19f   :  { %1033 = vmatpush1.bf16.msra.mxu1 %v1989_v4 }
 0x1a0   :  { %1034 = vmatprep.subr.bf16.mxu1 %v1994_v5  ;;  %1461 = vmatpush1.bf16.msra.mxu0 %v2044_v35  ;;  %v832_v35 = vld [vmem:[%s2675_s6] sm:$0x3] }
 0x1a1   :  { %1462 = vmatprep.subr.bf16.mxu0 %v2051_v27  ;;  %v837_v36 = vrot.slane %v832_v35, %v2433_v44 }
 0x1a3   :  { %1035 = vmatpush1.bf16.msra.mxu1 %v1992_v6 }
 0x1a4   :  { %1764 = vmatprep.subr.bf16.mxu1 %v2022_v12  ;;  %1463 = vmatpush1.bf16.msra.mxu0 %v2049_v29  ;;  %v1161_v29 = vld [vmem:[%s2677_s8] sm:$0x7]  ;;  %s2138_s8 = smov [#allocation7]  }
 0x1a5   :  { %1464 = vmatprep.subr.bf16.mxu0 %v2056_v31  ;;  %v2620_v31 = vrot.slane %v1161_v29, %v2433_v44  ;;  %s1596_s1 = sshll.u32 %s2138_s8, 4  ;;  %s1597_s1 = int_to_ptr.vmem [resolvable:$true] %s1596_s1 }
 0x1a6   :  { %s2103_s11 = scalar_lea.vmem %s1597_s1, 2688  ;;  %p2108_p3 = scmp.lt.s32.totalorder %s1597_s1, %s1597_s1 }
 0x1a7   :  { %p2104_p2 = scmp.ne.s32.totalorder %s1597_s1, %s2103_s11  ;;  %p2109_p4 = scmp.lt.s32.totalorder %s2103_s11, %s2103_s11 }
 0x1a8   :  { %1465 = vmatpush1.bf16.msra.mxu0 %v2054_v33 }
 0x1a9   :  { %p2110_p5 = por %p2109_p4, %p2108_p3 }
 0x1ab   :  { %p2111_p6 = pnand %p2110_p5, %p2104_p2 }
 0x239   :  { %v755_v38 = vpop.f32.mrb[0].mxu1 }
 0x23a   :  { %v757_v40 = vpop.f32.mrb[1].mxu1  ;;  %v756_v42 = vadd.f32 %v755_v38, %v554_v37 }
 0x23b   :  { %v759_v41 = vpop.f32.mrb[2].mxu1  ;;  %v758_v50 = vadd.f32 %v757_v40, %v558_v39 }
 0x23c   :  { %v760_v45 = vadd.f32 %v759_v41, %v554_v37  ;;  %v761_v49 = vpop.f32.mrb[3].mxu1 }
 0x23d   :  { %v762_v51 = vadd.f32 %v761_v49, %v558_v39 }
 0x23e   :  { %v792_v52 = vpack.c.bf16 %v760_v45, %v756_v42 }
 0x23f   :  { %v793_v53 = vpack.c.bf16 %v762_v51, %v758_v50 }
 0x241   :  { %v765_v48 = vpop.f32.mrb[4].mxu1  ;;  %1036 = vmatprep.mubr.bf16.mxu1 %v793_v53 }
 0x242   :  { %v767_v55 = vpop.f32.mrb[5].mxu1  ;;  %1037 = vmatmul.mubr.bf16.vlgmr.msra.gmra.mrb[16].mxu1 %v792_v52  ;;  %v766_v58 = vadd.f32 %v765_v48, %v554_v37 }
 0x243   :  { %v769_v56 = vpop.f32.mrb[6].mxu1  ;;  %1765 = vmatpush3.bf16.msra.mxu1 %v2023_v47  ;;  %v768_v62 = vadd.f32 %v767_v55, %v558_v39 }
 0x244   :  { %v770_v59 = vadd.f32 %v769_v56, %v554_v37  ;;  %v771_v60 = vpop.f32.mrb[7].mxu1  ;;  %1766 = vmatprep.subr.bf16.mxu1 %v2027_v54 }
 0x245   :  { %v772_v63 = vadd.f32 %v771_v60, %v558_v39 }
 0x246   :  { %v794_v0 = vpack.c.bf16 %v770_v59, %v766_v58 }
 0x247   :  { %v795_v1 = vpack.c.bf16 %v772_v63, %v768_v62  ;;  %1767 = vmatpush3.bf16.msra.mxu1 %v2028_v57 }
 0x248   :  { %1768 = vmatprep.subr.bf16.mxu1 %v2032_v61 }
 0x249   :  { %v775_v4 = vpop.f32.mrb[8].mxu1  ;;  %1046 = vmatprep.mubr.bf16.mxu1 %v795_v1 }
 0x24a   :  { %v777_v5 = vpop.f32.mrb[9].mxu1  ;;  %1047 = vmatmul.mubr.bf16.gmra.mrb[20].mxu1 %v794_v0  ;;  %v776_v8 = vadd.f32 %v775_v4, %v554_v37 }
 0x24b   :  { %v779_v6 = vpop.f32.mrb[10].mxu1  ;;  %1769 = vmatpush3.bf16.msra.mxu1 %v2033_v2  ;;  %v778_v12 = vadd.f32 %v777_v5, %v558_v39 }
 0x24c   :  { %v780_v9 = vadd.f32 %v779_v6, %v554_v37  ;;  %v781_v10 = vpop.f32.mrb[11].mxu1  ;;  %1770 = vmatprep.subr.bf16.mxu1 %v2037_v3 }
 0x24d   :  { %v782_v13 = vadd.f32 %v781_v10, %v558_v39 }
 0x24e   :  { %v796_v14 = vpack.c.bf16 %v780_v9, %v776_v8 }
 0x24f   :  { %v797_v15 = vpack.c.bf16 %v782_v13, %v778_v12  ;;  %1771 = vmatpush3.bf16.msra.mxu1 %v2038_v7 }
 0x250   :  { %1772 = vmatprep.subr.bf16.mxu1 %v2042_v11 }
 0x251   :  { %v785_v18 = vpop.f32.mrb[12].mxu1  ;;  %1056 = vmatprep.mubr.bf16.mxu1 %v797_v15 }
 0x252   :  { %v787_v19 = vpop.f32.mrb[13].mxu1  ;;  %1057 = vmatmul.mubr.bf16.gmra.mrb[24].mxu1 %v796_v14  ;;  %v786_v22 = vadd.f32 %v785_v18, %v554_v37  ;;  %v841_v37 = vrot.slane %v832_v35, %v2439_v46 }
 0x253   :  { %v788_v20 = vadd.f32 %v787_v19, %v558_v39  ;;  %v789_v21 = vpop.f32.mrb[14].mxu1  ;;  %1773 = vmatpush3.bf16.msra.mxu1 %v2043_v16 }
 0x254   :  { %v790_v23 = vpop.f32.mrb[15].mxu1  ;;  %1774 = vmatprep.subr.bf16.mxu1 %v2047_v17  ;;  %v798_v25 = vpack.c.bf16 %v786_v22, %v786_v22 }
 0x255   :  { %v799_v24 = vpack.c.bf16 %v788_v20, %v788_v20 }
 0x257   :  { %1066 = vmatprep.mubr.bf16.mxu1 %v799_v24  ;;  %1775 = vmatpush3.bf16.msra.mxu1 %v2048_v26 }
 0x258   :  { %1776 = vmatprep.subr.bf16.mxu1 %v2052_v28 }
 0x25a   :  { %1067 = vmatmul.mubr.bf16.gmra.mrb[28].mxu1 %v798_v25 }
 0x25b   :  { %1777 = vmatpush3.bf16.msra.mxu1 %v2053_v30  ;;  %v1173_v30 = vsub.s32 2, %v2430_v43 }
 0x25c   :  { %1778 = vmatprep.subr.bf16.mxu1 %v2057_v32  ;;  %v2623_v32 = vrot.slane %v1161_v29, %v2439_v46 }
 0x25d   :  { %v2625_v35 = vrot.slane %v1161_v29, %v1173_v30 }
 0x25f   :  { %1779 = vmatpush3.bf16.msra.mxu1 %v2058_v34 }
 0x315   :  { %v1038_v38 = vpop.f32.mrb[16].mxu1 }
 0x316   :  { %v1039_v39 = vadd.f32 %v1038_v38, %v837_v36  ;;  %v1040_v40 = vpop.f32.mrb[17].mxu1 }
 0x317   :  { %v1041_v41 = vadd.f32 %v1040_v40, %v841_v37  ;;  %v1042_v42 = vpop.f32.mrb[18].mxu1 }
 0x318   :  { %v1043_v45 = vadd.f32 %v1042_v42, %v837_v36  ;;  %v1044_v49 = vpop.f32.mrb[19].mxu1  ;;  %v1075_v51 = vmax.f32 %v1039_v39, 0.0 }
 0x319   :  { %v1045_v50 = vadd.f32 %v1044_v49, %v841_v37  ;;  %v1076_v53 = vmax.f32 %v1041_v41, 0.0 }
 0x31a   :  { %v1077_v52 = vmax.f32 %v1043_v45, 0.0 }
 0x31b   :  { %v1078_v47 = vmax.f32 %v1045_v50, 0.0 }
 0x31c   :  { %v1089_v54 = vpack.c.bf16 %v1077_v52, %v1075_v51 }
 0x31d   :  { %v1090_v48 = vpack.c.bf16 %v1078_v47, %v1076_v53  ;;  %v1048_v55 = vpop.f32.mrb[20].mxu1 }
 0x31e   :  { %v1049_v56 = vadd.f32 %v1048_v55, %v837_v36  ;;  %v1050_v57 = vpop.f32.mrb[21].mxu1 }
 0x31f   :  { %v1051_v58 = vadd.f32 %v1050_v57, %v841_v37  ;;  %v1052_v59 = vpop.f32.mrb[22].mxu1  ;;  %1466 = vmatprep.mubr.bf16.mxu0 %v1090_v48  ;;  %1537 = vmatprep.mubr.bf16.mxu1 %v1090_v48 }
 0x320   :  { %v1053_v60 = vadd.f32 %v1052_v59, %v837_v36  ;;  %v1054_v61 = vpop.f32.mrb[23].mxu1  ;;  %1467 = vmatmul.mubr.bf16.vlgmr.msra.gmra.mrb[16].mxu0 %v1089_v54  ;;  %1538 = vmatmul.mubr.bf16.vlgmr.msra.gmra.mrb[32].mxu1 %v1089_v54  ;;  %v1079_v63 = vmax.f32 %v1049_v56, 0.0 }
 0x321   :  { %v1055_v62 = vadd.f32 %v1054_v61, %v841_v37  ;;  %v1080_v1 = vmax.f32 %v1051_v58, 0.0 }
 0x322   :  { %v1081_v0 = vmax.f32 %v1053_v60, 0.0 }
 0x323   :  { %v1082_v2 = vmax.f32 %v1055_v62, 0.0 }
 0x324   :  { %v1091_v3 = vpack.c.bf16 %v1081_v0, %v1079_v63 }
 0x325   :  { %v1092_v4 = vpack.c.bf16 %v1082_v2, %v1080_v1  ;;  %v1058_v5 = vpop.f32.mrb[24].mxu1 }
 0x326   :  { %v1059_v6 = vadd.f32 %v1058_v5, %v837_v36  ;;  %v1060_v7 = vpop.f32.mrb[25].mxu1 }
 0x327   :  { %v1061_v8 = vadd.f32 %v1060_v7, %v841_v37  ;;  %v1062_v9 = vpop.f32.mrb[26].mxu1  ;;  %1476 = vmatprep.mubr.bf16.mxu0 %v1092_v4  ;;  %1545 = vmatprep.mubr.bf16.mxu1 %v1092_v4 }
 0x328   :  { %v1063_v10 = vadd.f32 %v1062_v9, %v837_v36  ;;  %v1064_v11 = vpop.f32.mrb[27].mxu1  ;;  %1477 = vmatmul.mubr.bf16.gmra.mrb[20].mxu0 %v1091_v3  ;;  %1546 = vmatmul.mubr.bf16.gmra.mrb[36].mxu1 %v1091_v3  ;;  %v1083_v13 = vmax.f32 %v1059_v6, 0.0 }
 0x329   :  { %v1065_v12 = vadd.f32 %v1064_v11, %v841_v37  ;;  %v1084_v15 = vmax.f32 %v1061_v8, 0.0 }
 0x32a   :  { %v1085_v14 = vmax.f32 %v1063_v10, 0.0 }
 0x32b   :  { %v1086_v16 = vmax.f32 %v1065_v12, 0.0 }
 0x32c   :  { %v1093_v17 = vpack.c.bf16 %v1085_v14, %v1083_v13 }
 0x32d   :  { %v1094_v18 = vpack.c.bf16 %v1086_v16, %v1084_v15  ;;  %v1068_v19 = vpop.f32.mrb[28].mxu1 }
 0x32e   :  { %v1069_v20 = vadd.f32 %v1068_v19, %v837_v36  ;;  %v1070_v21 = vpop.f32.mrb[29].mxu1 }
 0x32f   :  { %v1071_v22 = vadd.f32 %v1070_v21, %v841_v37  ;;  %v1072_v23 = vpop.f32.mrb[30].mxu1  ;;  %1486 = vmatprep.mubr.bf16.mxu0 %v1094_v18  ;;  %1553 = vmatprep.mubr.bf16.mxu1 %v1094_v18 }
 0x330   :  { %v1073_v24 = vpop.f32.mrb[31].mxu1  ;;  %1487 = vmatmul.mubr.bf16.gmra.mrb[24].mxu0 %v1093_v17  ;;  %1554 = vmatmul.mubr.bf16.gmra.mrb[40].mxu1 %v1093_v17  ;;  %v1087_v26 = vmax.f32 %v1069_v20, 0.0 }
 0x331   :  { %v1088_v25 = vmax.f32 %v1071_v22, 0.0 }
 0x332   :  { %v1095_v28 = vpack.c.bf16 %v1087_v26, %v1087_v26 }
 0x333   :  { %v1096_v27 = vpack.c.bf16 %v1088_v25, %v1088_v25 }
 0x335   :  { %1496 = vmatprep.mubr.bf16.mxu0 %v1096_v27  ;;  %1561 = vmatprep.mubr.bf16.mxu1 %v1096_v27 }
 0x338   :  { %1497 = vmatmul.mubr.bf16.gmra.mrb[28].mxu0 %v1095_v28  ;;  %1562 = vmatmul.mubr.bf16.gmra.mrb[44].mxu1 %v1095_v28 }
 0x3f3   :  { %v1468_v33 = vpop.f32.mrb[16].mxu0  ;;  %v1780_v34 = vpop.f32.mrb[32].mxu1 }
 0x3f4   :  { %v1469_v36 = vadd.f32 %v1468_v33, %v2620_v31  ;;  %v1470_v37 = vpop.f32.mrb[17].mxu0  ;;  %v1781_v38 = vpop.f32.mrb[33].mxu1 }
 0x3f5   :  { %v1471_v39 = vadd.f32 %v1470_v37, %v2623_v32  ;;  %v1782_v40 = vadd.f32 %v1781_v38, %v1780_v34  ;;  %v1472_v41 = vpop.f32.mrb[18].mxu0  ;;  %v1783_v42 = vpop.f32.mrb[34].mxu1 }
 0x3f6   :  { %1569 = vst [vmem:[#allocation7] sm:$0xff] %v1469_v36  ;;  %v1473_v43 = vadd.f32 %v1472_v41, %v2620_v31  ;;  %v1474_v44 = vpop.f32.mrb[19].mxu0  ;;  %v1784_v45 = vpop.f32.mrb[35].mxu1 }
 0x3f7   :  { %1570 = vst [vmem:[#allocation7 + $0x8] sm:$0xff] %v1471_v39  ;;  %v1540_v46 = vadd.f32 %v1782_v40, %v2625_v35  ;;  %v1475_v49 = vadd.f32 %v1474_v44, %v2623_v32  ;;  %v1785_v50 = vadd.f32 %v1784_v45, %v1783_v42 }
 0x3f8   :  { %1572 = vst [vmem:[#allocation7 + $0x18] sm:$0xff] %v1473_v43 }
 0x3f9   :  { %1571 = vst.msk [vmem:[#allocation7 + $0x10] sm:$0xff] %vm333_vm1, %v1540_v46  ;;  %1573 = vst [vmem:[#allocation7 + $0x20] sm:$0xff] %v1475_v49  ;;  %v1543_v51 = vadd.f32 %v1785_v50, %v2625_v35 }
 0x3fb   :  { %1574 = vst.msk [vmem:[#allocation7 + $0x28] sm:$0xff] %vm333_vm1, %v1543_v51  ;;  %v1478_v52 = vpop.f32.mrb[20].mxu0  ;;  %v1786_v53 = vpop.f32.mrb[36].mxu1 }
 0x3fc   :  { %v1479_v47 = vadd.f32 %v1478_v52, %v2620_v31  ;;  %v1480_v54 = vpop.f32.mrb[21].mxu0  ;;  %v1787_v48 = vpop.f32.mrb[37].mxu1 }
 0x3fd   :  { %v1481_v55 = vadd.f32 %v1480_v54, %v2623_v32  ;;  %v1788_v56 = vadd.f32 %v1787_v48, %v1786_v53  ;;  %v1482_v57 = vpop.f32.mrb[22].mxu0  ;;  %v1789_v58 = vpop.f32.mrb[38].mxu1 }
 0x3fe   :  { %1575 = vst [vmem:[#allocation7 + $0x30] sm:$0xff] %v1479_v47  ;;  %v1483_v59 = vadd.f32 %v1482_v57, %v2620_v31  ;;  %v1484_v60 = vpop.f32.mrb[23].mxu0  ;;  %v1790_v61 = vpop.f32.mrb[39].mxu1 }
 0x3ff   :  { %1576 = vst [vmem:[#allocation7 + $0x38] sm:$0xff] %v1481_v55  ;;  %v1548_v62 = vadd.f32 %v1788_v56, %v2625_v35  ;;  %v1485_v63 = vadd.f32 %v1484_v60, %v2623_v32  ;;  %v1791_v0 = vadd.f32 %v1790_v61, %v1789_v58 }
 0x400   :  { %1578 = vst [vmem:[#allocation7 + $0x48] sm:$0xff] %v1483_v59 }
 0x401   :  { %1577 = vst.msk [vmem:[#allocation7 + $0x40] sm:$0xff] %vm333_vm1, %v1548_v62  ;;  %1579 = vst [vmem:[#allocation7 + $0x50] sm:$0xff] %v1485_v63  ;;  %v1551_v1 = vadd.f32 %v1791_v0, %v2625_v35 }
 0x403   :  { %1580 = vst.msk [vmem:[#allocation7 + $0x58] sm:$0xff] %vm333_vm1, %v1551_v1  ;;  %v1488_v2 = vpop.f32.mrb[24].mxu0  ;;  %v1792_v3 = vpop.f32.mrb[40].mxu1 }
 0x404   :  { %v1489_v4 = vadd.f32 %v1488_v2, %v2620_v31  ;;  %v1490_v5 = vpop.f32.mrb[25].mxu0  ;;  %v1793_v6 = vpop.f32.mrb[41].mxu1 }
 0x405   :  { %v1491_v7 = vadd.f32 %v1490_v5, %v2623_v32  ;;  %v1794_v8 = vadd.f32 %v1793_v6, %v1792_v3  ;;  %v1492_v9 = vpop.f32.mrb[26].mxu0  ;;  %v1795_v10 = vpop.f32.mrb[42].mxu1 }
 0x406   :  { %1581 = vst [vmem:[#allocation7 + $0x60] sm:$0xff] %v1489_v4  ;;  %v1493_v11 = vadd.f32 %v1492_v9, %v2620_v31  ;;  %v1494_v12 = vpop.f32.mrb[27].mxu0  ;;  %v1796_v13 = vpop.f32.mrb[43].mxu1 }
 0x407   :  { %1582 = vst [vmem:[#allocation7 + $0x68] sm:$0xff] %v1491_v7  ;;  %v1556_v14 = vadd.f32 %v1794_v8, %v2625_v35  ;;  %v1495_v15 = vadd.f32 %v1494_v12, %v2623_v32  ;;  %v1797_v16 = vadd.f32 %v1796_v13, %v1795_v10 }
 0x408   :  { %1584 = vst [vmem:[#allocation7 + $0x78] sm:$0xff] %v1493_v11 }
 0x409   :  { %1583 = vst.msk [vmem:[#allocation7 + $0x70] sm:$0xff] %vm333_vm1, %v1556_v14  ;;  %1585 = vst [vmem:[#allocation7 + $0x80] sm:$0xff] %v1495_v15  ;;  %v1559_v17 = vadd.f32 %v1797_v16, %v2625_v35 }
 0x40b   :  { %1586 = vst.msk [vmem:[#allocation7 + $0x88] sm:$0xff] %vm333_vm1, %v1559_v17  ;;  %v1498_v18 = vpop.f32.mrb[28].mxu0  ;;  %v1798_v19 = vpop.f32.mrb[44].mxu1 }
 0x40c   :  { %v1499_v20 = vadd.f32 %v1498_v18, %v2620_v31  ;;  %v1500_v21 = vpop.f32.mrb[29].mxu0  ;;  %v1799_v22 = vpop.f32.mrb[45].mxu1 }
 0x40d   :  { %v1501_v23 = vadd.f32 %v1500_v21, %v2623_v32  ;;  %v1800_v24 = vadd.f32 %v1799_v22, %v1798_v19  ;;  %v1502_v25 = vpop.f32.mrb[30].mxu0  ;;  %v1801_v26 = vpop.f32.mrb[46].mxu1 }
 0x40e   :  { %1587 = vst [vmem:[#allocation7 + $0x90] sm:$0x3] %v1499_v20  ;;  %v1503_v27 = vpop.f32.mrb[31].mxu0  ;;  %v1802_v28 = vpop.f32.mrb[47].mxu1 }
 0x40f   :  { %1588 = vst [vmem:[#allocation7 + $0x98] sm:$0x3] %v1501_v23  ;;  %v1564_v29 = vadd.f32 %v1800_v24, %v2625_v35 }
 0x411   :  { %1590 = vst.msk [vmem:[#allocation7 + $0xa0] sm:$0x3] %vm1589_vm2, %v1564_v29 }
 0x412   :  { %2114 = shalt.err (!%p2111_p6)
}
 0x413   :  { %s2115_s10 = scalar_lea.hbm %s2678_s9, 2688 }
 0x414   :  { %p2116_p7 = scmp.ne.s32.totalorder %s2678_s9, %s2115_s10  ;;  %p2119_p8 = scmp.lt.u32.totalorder %s2115_s10, %s2678_s9 }
 0x416   :  { %p2121_p9 = pnand %p2119_p8, %p2116_p7 }
 0x418   :  { %2124 = shalt.err (!%p2121_p9)
}
 0x419   :  { %1602 = dma.vmem_to_hbm [thread:$0]  %s1597_s1, 2688, %s2678_s9, [#allocation4], %s2132_s19, %s2132_s19, %s2133_s20  }
 0x41a   :  { %2129 = dma.done.wait [#allocation4], 2688  }
 0x41b   :  { %2130 = vsyncadd [#allocation4], 4294964608 }
 0x41c   :  { %1606 = vsyncpa [#allocation3], 1 }
 0x41d   :  { %1607 = vsyncpa [#allocation6], 1 }
 0x41e   :  { %1608 = vsyncpa [#allocation4], 1 }

</bundles_post_ra>
